<compile_context>
chip_gen: v6e
topology: v6e:2x2x1
jax: 0.10.0
libtpu: 0.0.40
codegen_flags: <defaults>
</compile_context>

<pallas_src>
import math

import jax
import jax.numpy as jnp
from jax import lax
from jax.experimental import pallas as pl
from jax.experimental.pallas import tpu as pltpu


def _vectorized_q_kernel(xs_ref, xa_ref, w1s_ref, w1a_ref, b1_ref,
                         w2_ref, b2_ref, w3_ref, b3_ref, out_ref):
    # xs_ref : (B, S)       xa_ref : (B, A)
    # w1s_ref: (S, E*H)     w1a_ref: (A, E*H)     b1_ref: (1, E*H)
    # w2_ref : (E*H, E*H)   (block-diagonal over the ensemble)   b2_ref: (1, E*H)
    # w3_ref : (E, E*H)     (row e holds w3[e] in cols e*H:(e+1)*H)   b3_ref: (E, 1)
    # out_ref: (E, B)

    # Layer 1: concat folded into two MXU passes (no wrapper concatenate / extra
    # HBM round trip for a fused input).
    h1 = (jnp.dot(xs_ref[...], w1s_ref[...], preferred_element_type=jnp.float32)
          + jnp.dot(xa_ref[...], w1a_ref[...], preferred_element_type=jnp.float32)
          + b1_ref[...])
    h1 = jnp.maximum(h1, 0.0)                                   # (B, E*H)

    # Layer 2: block-diagonal weights -> one MXU pass covers every critic.
    # TODO(synk): at training-scale H (>=128) replace with E per-critic lane-aligned
    # dots (or a grid axis over E) to avoid (E-1)/E wasted MXU FLOPs and weight VMEM.
    h2 = jnp.dot(h1, w2_ref[...], preferred_element_type=jnp.float32) + b2_ref[...]
    h2 = jnp.maximum(h2, 0.0)                                   # (B, E*H)

    # Layer 3: one MXU matmul against the block-structured weight, contracting the
    # feature dims so the result is already (E, B). Replaces the old VPU-multiply +
    # per-critic XLU reductions + concat epilogue and the wrapper transpose.
    q = lax.dot_general(w3_ref[...], h2, (((1,), (1,)), ((), ())),
                        preferred_element_type=jnp.float32) + b3_ref[...]   # (E, B)

    out_ref[...] = q.astype(out_ref.dtype)                      # one dense store


def prepare_params(params, state_dim):
    """One-time repack of the (E, in, out) ensemble weights into the fused layouts the
    kernel consumes. Call at parameter-update time (or cache), NOT per forward call."""
    (w1, b1), (w2, b2), (w3, b3) = params
    E, d_in, H = w1.shape

    # Layer 1: ensemble fused into the lane (N) axis (col e*H+h == w1[e, :, h]), then
    # split at the state/action boundary so the kernel never needs a concatenated input.
    w1f = jnp.transpose(w1, (1, 0, 2)).reshape(d_in, E * H)
    w1s = w1f[:state_dim]                                       # (S, E*H)
    w1a = w1f[state_dim:]                                       # (A, E*H)
    b1f = b1.reshape(1, E * H)

    # Layer 2: block diagonal so a single MXU pass covers every critic.
    w2bd = jnp.zeros((E * H, E * H), w2.dtype)
    for e in range(E):
        w2bd = w2bd.at[e * H:(e + 1) * H, e * H:(e + 1) * H].set(w2[e])
    b2f = b2.reshape(1, E * H)

    # Layer 3: block-structured (E, E*H); row e = w3[e, :, 0] in cols e*H:(e+1)*H.
    w3blk = jnp.zeros((E, E * H), w3.dtype)
    for e in range(E):
        w3blk = w3blk.at[e, e * H:(e + 1) * H].set(w3[e, :, 0])
    b3f = b3.reshape(E, 1)

    # TODO(synk): for v6e/v7x training-scale shapes, cast the fused weights to bf16 here
    # (keep preferred_element_type=f32 and f32 bias/ReLU in the kernel) to halve weight
    # VMEM/DMA traffic; re-check tolerances against the f32 reference.
    return (w1s, w1a, b1f, w2bd, b2f, w3blk, b3f)


def vectorized_q_forward(state, action, fused_params):
    """state: (B, state_dim), action: (B, action_dim) -> q_values: (E, B)."""
    w1s, w1a, b1f, w2bd, b2f, w3blk, b3f = fused_params
    B = state.shape[0]
    E = w3blk.shape[0]

    # TODO(synk): at training-scale B (>=128), add a BlockSpec grid over B marked
    # dimension_semantics=("parallel",) (2 TCs on v7x), give weights/biases constant
    # index_maps so they stay VMEM-resident (only x/out double-buffered), and set
    # pltpu.CompilerParams(vmem_limit_bytes=...) against v7x's 64 MiB budget.
    vmem = pl.BlockSpec(memory_space=pltpu.MemorySpace.VMEM)
    return pl.pallas_call(
        _vectorized_q_kernel,
        out_shape=jax.ShapeDtypeStruct((E, B), jnp.float32),
        in_specs=[vmem] * 9,
        out_specs=vmem,
    )(state, action, w1s, w1a, b1f, w2bd, b2f, w3blk, b3f)


def init_params(key, state_dim, action_dim, hidden_dim, num_critics):
    """Deterministic init mirroring VectorizedQ.__init__ (kaiming-uniform-like,
    bias=0.1 on hidden layers, uniform(-0.003, 0.003) on the last layer)."""
    d_in = state_dim + action_dim
    keys = jax.random.split(key, 4)

    def kaiming_uniform(k, shape, fan_in):
        bound = 1.0 / math.sqrt(fan_in)          # kaiming_uniform with a=sqrt(5)
        return jax.random.uniform(k, shape, jnp.float32, -bound, bound)

    w1 = kaiming_uniform(keys[0], (num_critics, d_in, hidden_dim), d_in)
    b1 = jnp.full((num_critics, 1, hidden_dim), 0.1, jnp.float32)

    w2 = kaiming_uniform(keys[1], (num_critics, hidden_dim, hidden_dim), hidden_dim)
    b2 = jnp.full((num_critics, 1, hidden_dim), 0.1, jnp.float32)

    w3 = jax.random.uniform(keys[2], (num_critics, hidden_dim, 1),
                            jnp.float32, -0.003, 0.003)
    b3 = jax.random.uniform(keys[3], (num_critics, 1, 1),
                            jnp.float32, -0.003, 0.003)

    return ((w1, b1), (w2, b2), (w3, b3))


def reference_forward(state, action, params):
    """Pure-JAX reference matching the PyTorch semantics."""
    (w1, b1), (w2, b2), (w3, b3) = params
    x = jnp.concatenate([state, action], axis=-1)               # (B, D_in)
    xs = jnp.broadcast_to(x, (w1.shape[0],) + x.shape)          # (E, B, D_in)
    hi = jax.lax.Precision.HIGHEST
    h = jnp.maximum(jnp.einsum('ebi,eio->ebo', xs, w1, precision=hi) + b1, 0.0)
    h = jnp.maximum(jnp.einsum('ebi,eio->ebo', h, w2, precision=hi) + b2, 0.0)
    q = jnp.einsum('ebi,eio->ebo', h, w3, precision=hi) + b3    # (E, B, 1)
    return q[..., 0]                                            # (E, B)


if __name__ == "__main__":
    state_dim, action_dim = 12, 4
    hidden_dim = 32
    num_critics = 5
    batch = 8

    key = jax.random.PRNGKey(0)
    k_params, k_state, k_action = jax.random.split(key, 3)

    params = init_params(k_params, state_dim, action_dim, hidden_dim, num_critics)
    state = jax.random.normal(k_state, (batch, state_dim), jnp.float32)
    action = jax.random.normal(k_action, (batch, action_dim), jnp.float32)

    # One-time repack (would be refreshed whenever the underlying params change).
    fused_params = jax.tree_util.tree_map(
        jax.block_until_ready, prepare_params(params, state_dim))

    q_kernel = vectorized_q_forward(state, action, fused_params)
    jax.block_until_ready(q_kernel)

    q_ref = reference_forward(state, action, params)
    assert q_kernel.shape == (num_critics, batch), q_kernel.shape
    assert jnp.allclose(q_kernel, q_ref, atol=1e-5, rtol=1e-5), "mismatch vs reference"

    print("KERNEL_OK")
</pallas_src>

<mosaic_0001>
module attributes {stable_mosaic.version = 11 : i64} {
  func.func @_vectorized_q_kernel(%arg0: memref<8x12xf32, #tpu.memory_space<vmem>>, %arg1: memref<8x4xf32, #tpu.memory_space<vmem>>, %arg2: memref<12x160xf32, #tpu.memory_space<vmem>>, %arg3: memref<4x160xf32, #tpu.memory_space<vmem>>, %arg4: memref<1x160xf32, #tpu.memory_space<vmem>>, %arg5: memref<160x160xf32, #tpu.memory_space<vmem>>, %arg6: memref<1x160xf32, #tpu.memory_space<vmem>>, %arg7: memref<5x160xf32, #tpu.memory_space<vmem>>, %arg8: memref<5x1xf32, #tpu.memory_space<vmem>>, %arg9: memref<5x8xf32, #tpu.memory_space<vmem>>) attributes {dimension_semantics = [], scalar_prefetch = 0 : i64, scratch_operands = 0 : i64, tpu.core_type = #tpu.core_type<tc>} {
    %c0 = arith.constant 0 : index
    %c0_0 = arith.constant 0 : index
    %0 = vector.load %arg0[%c0, %c0_0] : memref<8x12xf32, #tpu.memory_space<vmem>>, vector<8x12xf32>
    %c0_1 = arith.constant 0 : index
    %c0_2 = arith.constant 0 : index
    %1 = vector.load %arg2[%c0_1, %c0_2] : memref<12x160xf32, #tpu.memory_space<vmem>>, vector<12x160xf32>
    %cst = arith.constant dense<0.000000e+00> : vector<8x160xf32>
    %2 = tpu.matmul %0, %1, %cst {dimension_numbers = #tpu.dot_dimension_numbers<[1], [0], [0], [1], [0, 0, 1, 1], [], []>} : vector<8x12xf32>, vector<12x160xf32>, vector<8x160xf32> -> vector<8x160xf32>
    %c0_3 = arith.constant 0 : index
    %c0_4 = arith.constant 0 : index
    %3 = vector.load %arg1[%c0_3, %c0_4] : memref<8x4xf32, #tpu.memory_space<vmem>>, vector<8x4xf32>
    %c0_5 = arith.constant 0 : index
    %c0_6 = arith.constant 0 : index
    %4 = vector.load %arg3[%c0_5, %c0_6] : memref<4x160xf32, #tpu.memory_space<vmem>>, vector<4x160xf32>
    %cst_7 = arith.constant dense<0.000000e+00> : vector<8x160xf32>
    %5 = tpu.matmul %3, %4, %cst_7 {dimension_numbers = #tpu.dot_dimension_numbers<[1], [0], [0], [1], [0, 0, 1, 1], [], []>} : vector<8x4xf32>, vector<4x160xf32>, vector<8x160xf32> -> vector<8x160xf32>
    %6 = arith.addf %2, %5 : vector<8x160xf32>
    %c0_8 = arith.constant 0 : index
    %c0_9 = arith.constant 0 : index
    %7 = vector.load %arg4[%c0_8, %c0_9] : memref<1x160xf32, #tpu.memory_space<vmem>>, vector<1x160xf32>
    %8 = vector.broadcast %7 : vector<1x160xf32> to vector<8x160xf32>
    %9 = arith.addf %6, %8 : vector<8x160xf32>
    %cst_10 = arith.constant 0.000000e+00 : f32
    %10 = vector.broadcast %cst_10 : f32 to vector<8x160xf32>
    %11 = arith.maximumf %9, %10 : vector<8x160xf32>
    %c0_11 = arith.constant 0 : index
    %c0_12 = arith.constant 0 : index
    %12 = vector.load %arg5[%c0_11, %c0_12] : memref<160x160xf32, #tpu.memory_space<vmem>>, vector<160x160xf32>
    %cst_13 = arith.constant dense<0.000000e+00> : vector<8x160xf32>
    %13 = tpu.matmul %11, %12, %cst_13 {dimension_numbers = #tpu.dot_dimension_numbers<[1], [0], [0], [1], [0, 0, 1, 1], [], []>} : vector<8x160xf32>, vector<160x160xf32>, vector<8x160xf32> -> vector<8x160xf32>
    %c0_14 = arith.constant 0 : index
    %c0_15 = arith.constant 0 : index
    %14 = vector.load %arg6[%c0_14, %c0_15] : memref<1x160xf32, #tpu.memory_space<vmem>>, vector<1x160xf32>
    %15 = vector.broadcast %14 : vector<1x160xf32> to vector<8x160xf32>
    %16 = arith.addf %13, %15 : vector<8x160xf32>
    %cst_16 = arith.constant 0.000000e+00 : f32
    %17 = vector.broadcast %cst_16 : f32 to vector<8x160xf32>
    %18 = arith.maximumf %16, %17 : vector<8x160xf32>
    %c0_17 = arith.constant 0 : index
    %c0_18 = arith.constant 0 : index
    %19 = vector.load %arg7[%c0_17, %c0_18] : memref<5x160xf32, #tpu.memory_space<vmem>>, vector<5x160xf32>
    %cst_19 = arith.constant dense<0.000000e+00> : vector<5x8xf32>
    %20 = tpu.matmul %19, %18, %cst_19 {dimension_numbers = #tpu.dot_dimension_numbers<[1], [1], [0], [0], [0, 0, 1, 0], [], []>} : vector<5x160xf32>, vector<8x160xf32>, vector<5x8xf32> -> vector<5x8xf32>
    %c0_20 = arith.constant 0 : index
    %c0_21 = arith.constant 0 : index
    %21 = vector.load %arg8[%c0_20, %c0_21] : memref<5x1xf32, #tpu.memory_space<vmem>>, vector<5x1xf32>
    %22 = vector.broadcast %21 : vector<5x1xf32> to vector<5x8xf32>
    %23 = arith.addf %20, %22 : vector<5x8xf32>
    %c0_22 = arith.constant 0 : index
    %c0_23 = arith.constant 0 : index
    %24 = vector.load %arg9[%c0_22, %c0_23] : memref<5x8xf32, #tpu.memory_space<vmem>>, vector<5x8xf32>
    tpu.vector_store %arg9[%c0_22, %c0_23], %23 {strides = array<i32>} : memref<5x8xf32, #tpu.memory_space<vmem>>, vector<5x8xf32>,
    return
  }
}

</mosaic_0001>

<bundles_post_ra>
// kernel: tpu_custom_call.1
= control target key start
LH: loop header
LB: loop body
LE: loop exit
PB: predicated region body
PF: predicated region fallthrough
CT: control target
= control target key end

     0   :  { %14 = vsyncpa [#allocation3], 0  ;;  %s692_s0 = inlined_call_operand.vmem [shape: f32[8,12], index: 0, kind: input, shape index: {}]   ;;  %s693_s1 = inlined_call_operand.vmem [shape: f32[8,4], index: 1, kind: input, shape index: {}]   ;;  %s694_s2 = inlined_call_operand.hbm [shape: f32[12,160], index: 2, kind: input, shape index: {}]   ;;  %s695_s3 = inlined_call_operand.hbm [shape: f32[4,160], index: 3, kind: input, shape index: {}]   ;;  %s696_s4 = inlined_call_operand.vmem [shape: f32[1,160], index: 4, kind: input, shape index: {}]   ;;  %s697_s5 = inlined_call_operand.hbm [shape: f32[160,160], index: 5, kind: input, shape index: {}]   ;;  %s698_s6 = inlined_call_operand.vmem [shape: f32[1,160], index: 6, kind: input, shape index: {}]   ;;  %s699_s7 = inlined_call_operand.vmem [shape: f32[5,160], index: 7, kind: input, shape index: {}]   ;;  %s700_s8 = inlined_call_operand.vmem [shape: f32[5,1], index: 8, kind: input, shape index: {}]   ;;  %s701_s9 = inlined_call_operand.hbm [shape: f32[5,8], index: 9, kind: output, shape index: {}]  }
   0x1   :  { %15 = vsyncpa [#allocation6], 0 }
   0x2   :  { %16 = vsyncpa [#allocation4], 0  ;;  %s594_s30 = smov [#allocation5]   ;;  %s595_s11 = smov [#allocation2]  }
   0x3   :  { %s39_s10 = sshll.u32 %s594_s30, 4  ;;  %s26_s12 = sshll.u32 %s595_s11, 4  ;;  %s40_s10 = int_to_ptr.vmem [resolvable:$true] %s39_s10  ;;  %s27_s12 = int_to_ptr.vmem [resolvable:$true] %s26_s12 }
   0x4   :  { %s516_s13 = scalar_lea.vmem %s40_s10, 128  ;;  %p521_p1 = scmp.lt.s32.totalorder %s40_s10, %s40_s10 }
   0x5   :  { %p517_p0 = scmp.ne.s32.totalorder %s40_s10, %s516_s13  ;;  %p522_p2 = scmp.lt.s32.totalorder %s516_s13, %s516_s13 }
   0x7   :  { %p523_p3 = por %p522_p2, %p521_p1 }
   0x9   :  { %p524_p4 = pnand %p523_p3, %p517_p0 }
   0xb   :  { %527 = shalt.err (!%p524_p4)
}
   0xc   :  { %42 = dma.hbm_to_vmem [thread:$0]  %s695_s3, 128, %s40_s10, [#allocation6]  }
   0xd   :  { %s536_s16 = scalar_lea.vmem %s27_s12, 512  ;;  %p541_p6 = scmp.lt.s32.totalorder %s27_s12, %s27_s12 }
   0xe   :  { %p537_p5 = scmp.ne.s32.totalorder %s27_s12, %s536_s16  ;;  %p542_p7 = scmp.lt.s32.totalorder %s536_s16, %s536_s16 }
  0x10   :  { %p543_p8 = por %p542_p7, %p541_p6 }
  0x12   :  { %p544_p9 = pnand %p543_p8, %p537_p5 }
  0x14   :  { %547 = shalt.err (!%p544_p9)
}
  0x15   :  { %s596_s17 = smov 256   ;;  %s597_s18 = smov 16  }
  0x16   :  { %32 = dma.hbm_to_vmem [thread:$0]  %s694_s2, 512, %s27_s12, [#allocation3], %s596_s17, %s596_s17, %s597_s18  }
  0x17   :  { %s598_s21 = smov [#allocation7]  }
  0x18   :  { %s50_s22 = sshll.u32 %s598_s21, 4  ;;  %s51_s22 = int_to_ptr.vmem [resolvable:$true] %s50_s22 }
  0x19   :  { %s556_s23 = scalar_lea.vmem %s51_s22, 5120  ;;  %p561_p11 = scmp.lt.s32.totalorder %s51_s22, %s51_s22 }
  0x1a   :  { %p557_p10 = scmp.ne.s32.totalorder %s51_s22, %s556_s23  ;;  %p562_p12 = scmp.lt.s32.totalorder %s556_s23, %s556_s23 }
  0x1c   :  { %p563_p13 = por %p562_p12, %p561_p11 }
  0x1e   :  { %p564_p0 = pnand %p563_p13, %p557_p10 }
  0x20   :  { %567 = shalt.err (!%p564_p0)
}
  0x21   :  { %56 = dma.hbm_to_vmem [thread:$0]  %s697_s5, 5120, %s51_s22, [#allocation6], %s596_s17, %s596_s17, %s597_s18  }
  0x22   :  { %588 = dma.done.wait [#allocation3], 512  }
  0x23   :  { %589 = vsyncadd [#allocation3], 4294966784 }
  0x24   :  { %590 = dma.done.wait [#allocation6], 5248  }
  0x25   :  { %591 = vsyncadd [#allocation6], 4294962048  ;;  %v599_v0 = vmov 0.0   ;;  %v78_v1 = vld [vmem:[#allocation5] sm:$0xff]  ;;  %vm85_vm0 = vcmask 1043456   ;;  %vm81_vm1 = vcmask 31744   ;;  %v244_v49 = vlaneseq }
  0x26   :  { %154 = vmatprep.mubr.f32.mxu1 %v599_v0  ;;  %v80_v2 = vcombine.high %v78_v1, %v78_v1  ;;  %v77_v3 = vld [vmem:[%s693_s1] sm:$0xff]  ;;  %v76_v4 = vld [vmem:[#allocation2 + $0x18] sm:$0xf]  ;;  %v75_v7 = vld [vmem:[#allocation2 + $0x10] sm:$0xf]  ;;  %vm161_vm2 = vcmask 97280  }
  0x27   :  { %v289_v5 = vld [vmem:[#allocation7 + $0xf8] sm:$0xff]  ;;  %v288_v6 = vld [vmem:[#allocation7 + $0xf0] sm:$0xff]  ;;  %v74_v8 = vld [vmem:[#allocation2 + $0x8] sm:$0xff]  ;;  %v245_v50 = vshrl.u32 %v244_v49, 7  ;;  %vm310_vm3 = vcmask 261120   ;;  %s601_s12 = smov [#allocation8]  }
  0x28   :  { %489 = vmatprep.subr.msk.mxu1 %vm85_vm0, %v80_v2  ;;  %314 = vmatprep.subr.mxu0 %v289_v5  ;;  %v287_v9 = vld [vmem:[#allocation7 + $0xe8] sm:$0xff]  ;;  %v73_v10 = vld [vmem:[#allocation2] sm:$0xff]  ;;  %v286_v11 = vld [vmem:[#allocation7 + $0xe0] sm:$0xff]  ;;  %s479_s13 = sshll.u32 %s601_s12, 4  ;;  %vm471_vm4 = vcmask 61440   ;;  %s480_s13 = int_to_ptr.vmem [resolvable:$true] %s479_s13 }
  0x29   :  { %490 = vmatpush1.msk.msra.mxu1 %vm85_vm0, %v78_v1  ;;  %315 = vmatpush1.msra.mxu0 %v288_v6  ;;  %v72_v12 = vld [vmem:[%s692_s0] sm:$0xff]  ;;  %v284_v14 = vld [vmem:[#allocation7 + $0xd0] sm:$0xff]  ;;  %v283_v15 = vld [vmem:[#allocation7 + $0xc8] sm:$0xff]  ;;  %v246_v52 = vsub.s32 0, %v245_v50  ;;  %v250_v54 = vsub.s32 1, %v245_v50  ;;  %p573_p2 = scmp.lt.s32.totalorder %s480_s13, %s480_s13 }
  0x2a   :  { %491 = vmatmul.mubr.msk.f32.vlgmr.msra.gmra.mxu1 %vm81_vm1, %v77_v3  ;;  %492 = vmatprep.subr.msk.mxu1 %vm85_vm0, %v76_v4  ;;  %v285_v13 = vld [vmem:[#allocation7 + $0xd8] sm:$0xff]  ;;  %v282_v16 = vld [vmem:[#allocation7 + $0xc0] sm:$0xff]  ;;  %v280_v18 = vld [vmem:[#allocation7 + $0xb0] sm:$0xff]  ;;  %v600_v4 = vmov 0  }
  0x2b   :  { %493 = vmatpush1.msk.msra.mxu1 %vm85_vm0, %v75_v7  ;;  %235 = vmatprep.mubr.f32.mxu1 %v599_v0  ;;  %v281_v17 = vld [vmem:[#allocation7 + $0xb8] sm:$0xff]  ;;  %v279_v19 = vld [vmem:[#allocation7 + $0xa8] sm:$0xff]  ;;  %v278_v20 = vld [vmem:[#allocation7 + $0xa0] sm:$0xff] }
  0x2c   :  { %201 = vmatprep.subr.mxu1 %v74_v8  ;;  %316 = vmatprep.subr.mxu0 %v287_v9  ;;  %v277_v21 = vld [vmem:[#allocation7 + $0x98] sm:$0xff]  ;;  %v276_v22 = vld [vmem:[#allocation7 + $0x90] sm:$0xff]  ;;  %v275_v23 = vld [vmem:[#allocation7 + $0x88] sm:$0xff] }
  0x2d   :  { %202 = vmatpush1.msra.mxu1 %v73_v10  ;;  %317 = vmatpush1.msra.mxu0 %v286_v11  ;;  %v274_v24 = vld [vmem:[#allocation7 + $0x80] sm:$0xff]  ;;  %v273_v25 = vld [vmem:[#allocation7 + $0x78] sm:$0xff]  ;;  %v272_v26 = vld [vmem:[#allocation7 + $0x70] sm:$0xff] }
  0x2e   :  { %494 = vmatmul.mubr.msk.f32.vlgmr.msra.gmra.mxu1 %vm161_vm2, %v72_v12  ;;  %318 = vmatprep.subr.mxu0 %v285_v13  ;;  %v271_v27 = vld [vmem:[#allocation7 + $0x68] sm:$0xff]  ;;  %v270_v28 = vld [vmem:[#allocation7 + $0x60] sm:$0xff]  ;;  %v269_v29 = vld [vmem:[#allocation7 + $0x58] sm:$0xff] }
  0x2f   :  { %319 = vmatpush1.msra.mxu0 %v284_v14  ;;  %v268_v30 = vld [vmem:[#allocation7 + $0x50] sm:$0xff]  ;;  %v267_v31 = vld [vmem:[#allocation7 + $0x48] sm:$0xff]  ;;  %v266_v32 = vld [vmem:[#allocation7 + $0x40] sm:$0xff]  ;;  %506 = vset.pattern.permute.xlu0 %v600_v4 }
  0x30   :  { %320 = vmatprep.subr.mxu0 %v283_v15  ;;  %v265_v33 = vld [vmem:[#allocation7 + $0x38] sm:$0xff]  ;;  %v264_v34 = vld [vmem:[#allocation7 + $0x30] sm:$0xff]  ;;  %v263_v35 = vld [vmem:[#allocation7 + $0x28] sm:$0xff] }
  0x31   :  { %321 = vmatpush1.msra.mxu0 %v282_v16  ;;  %v262_v36 = vld [vmem:[#allocation7 + $0x20] sm:$0xff]  ;;  %v261_v37 = vld [vmem:[#allocation7 + $0x18] sm:$0xff]  ;;  %v260_v38 = vld [vmem:[#allocation7 + $0x10] sm:$0xff] }
  0x32   :  { %322 = vmatprep.subr.mxu0 %v281_v17  ;;  %v259_v39 = vld [vmem:[#allocation7 + $0x8] sm:$0xff]  ;;  %v258_v40 = vld [vmem:[#allocation7] sm:$0xff]  ;;  %v297_v41 = vld [vmem:[#allocation7 + $0x138] sm:$0xff] }
  0x33   :  { %323 = vmatpush1.msra.mxu0 %v280_v18  ;;  %v296_v42 = vld [vmem:[#allocation7 + $0x130] sm:$0xff]  ;;  %v295_v43 = vld [vmem:[#allocation7 + $0x128] sm:$0xff]  ;;  %v294_v44 = vld [vmem:[#allocation7 + $0x120] sm:$0xff] }
  0x34   :  { %324 = vmatprep.subr.mxu0 %v279_v19  ;;  %v293_v45 = vld [vmem:[#allocation7 + $0x118] sm:$0xff]  ;;  %v292_v46 = vld [vmem:[#allocation7 + $0x110] sm:$0xff]  ;;  %v291_v47 = vld [vmem:[#allocation7 + $0x108] sm:$0xff] }
  0x35   :  { %325 = vmatpush1.msra.mxu0 %v278_v20  ;;  %v290_v48 = vld [vmem:[#allocation7 + $0x100] sm:$0xff]  ;;  %v242_v53 = vld [vmem:[%s696_s4] sm:$0x3] }
  0x36   :  { %326 = vmatprep.subr.mxu0 %v277_v21  ;;  %v247_v57 = vrot.slane %v242_v53, %v246_v52  ;;  %v251_v59 = vrot.slane %v242_v53, %v250_v54  ;;  %v388_v2 = vld [vmem:[%s699_s7 + $0x8] sm:$0x1f]  ;;  %v389_v3 = vld [vmem:[%s700_s8] sm:$0x1f] }
  0x37   :  { %327 = vmatpush1.msra.mxu0 %v276_v22  ;;  %497 = vmatprep.mubr.msk.f32.mxu1 %vm310_vm3, %v388_v2  ;;  %v298_v5 = vld [vmem:[%s698_s6] sm:$0x3]  ;;  %s568_s6 = scalar_lea.vmem %s480_s13, 128 }
  0x38   :  { %328 = vmatprep.subr.mxu0 %v275_v23  ;;  %392 = vperm.xlu0 %506, %v389_v3   ;;  %v303_v6 = vrot.slane %v298_v5, %v246_v52  ;;  %v307_v7 = vrot.slane %v298_v5, %v250_v54  ;;  %v387_v14 = vld [vmem:[%s699_s7] sm:$0x1f]  ;;  %p569_p1 = scmp.ne.s32.totalorder %s480_s13, %s568_s6  ;;  %p574_p3 = scmp.lt.s32.totalorder %s568_s6, %s568_s6 }
  0x39   :  { %329 = vmatpush1.msra.mxu0 %v274_v24 }
  0x3a   :  { %330 = vmatprep.subr.mxu0 %v273_v25  ;;  %p575_p4 = por %p574_p3, %p573_p2 }
  0x3b   :  { %331 = vmatpush1.msra.mxu0 %v272_v26 }
  0x3c   :  { %332 = vmatprep.subr.mxu0 %v271_v27  ;;  %p576_p5 = pnand %p575_p4, %p569_p1 }
  0x3d   :  { %333 = vmatpush1.msra.mxu0 %v270_v28 }
  0x3e   :  { %334 = vmatprep.subr.mxu0 %v269_v29 }
  0x3f   :  { %335 = vmatpush1.msra.mxu0 %v268_v30 }
  0x40   :  { %336 = vmatprep.subr.mxu0 %v267_v31 }
  0x41   :  { %337 = vmatpush1.msra.mxu0 %v266_v32 }
  0x42   :  { %338 = vmatprep.subr.mxu0 %v265_v33 }
  0x43   :  { %339 = vmatpush1.msra.mxu0 %v264_v34 }
  0x44   :  { %340 = vmatprep.subr.mxu0 %v263_v35 }
  0x45   :  { %341 = vmatpush1.msra.mxu0 %v262_v36 }
  0x46   :  { %342 = vmatprep.subr.mxu0 %v261_v37 }
  0x47   :  { %343 = vmatpush1.msra.mxu0 %v260_v38 }
  0x48   :  { %344 = vmatprep.subr.mxu0 %v259_v39 }
  0x49   :  { %345 = vmatpush1.msra.mxu0 %v258_v40 }
  0x4a   :  { %370 = vmatprep.subr.mxu0 %v297_v41 }
  0x4b   :  { %371 = vmatpush2.msra.mxu0 %v296_v42 }
  0x4c   :  { %372 = vmatprep.subr.mxu0 %v295_v43 }
  0x4d   :  { %373 = vmatpush2.msra.mxu0 %v294_v44 }
  0x4e   :  { %374 = vmatprep.subr.mxu0 %v293_v45 }
  0x4f   :  { %375 = vmatpush2.msra.mxu0 %v292_v46 }
  0x50   :  { %376 = vmatprep.subr.mxu0 %v291_v47 }
  0x51   :  { %377 = vmatpush2.msra.mxu0 %v290_v48 }
  0xb3   :  { %v393_v15 = vpop.permute.xlu0 %392 }
  0xea   :  { %v156_v51 = vpop.f32.mrf.mxu1 }
  0xec   :  { %v158_v55 = vpop.f32.mrf.mxu1 }
  0xee   :  { %v237_v56 = vpop.f32.mrf.mxu1 }
  0xef   :  { %v238_v58 = vadd.f32 %v237_v56, %v156_v51 }
  0xf0   :  { %v239_v60 = vpop.f32.mrf.mxu1 }
  0xf1   :  { %v240_v61 = vadd.f32 %v239_v60, %v158_v55  ;;  %v254_v62 = vadd.f32 %v247_v57, %v238_v58 }
  0xf3   :  { %v255_v63 = vadd.f32 %v251_v59, %v240_v61  ;;  %v256_v1 = vmax.f32 %v254_v62, 0.0 }
  0xf5   :  { %v257_v0 = vmax.f32 %v255_v63, 0.0 }
  0xf7   :  { %495 = vmatprep.mubr.msk.f32.mxu0 %vm310_vm3, %v257_v0 }
  0xf8   :  { %379 = vmatmul.mubr.f32.vlgmr.msra.gmra.mxu0 %v256_v1 }
 0x1b8   :  { %v380_v8 = vpop.f32.mrf.mxu0 }
 0x1b9   :  { %v381_v9 = vadd.f32 %v380_v8, %v303_v6 }
 0x1ba   :  { %v382_v10 = vpop.f32.mrf.mxu0 }
 0x1bb   :  { %v383_v11 = vadd.f32 %v382_v10, %v307_v7  ;;  %v385_v13 = vmax.f32 %v381_v9, 0.0 }
 0x1bd   :  { %v386_v12 = vmax.f32 %v383_v11, 0.0 }
 0x1bf   :  { %496 = vmatprep.subr.msk.mxu1 %vm310_vm3, %v386_v12 }
 0x1c0   :  { %432 = vmatpush1.xpose.msra.mxu1 %v385_v13 }
 0x1c3   :  { %466 = vmatmul.mubr.f32.vlgmr.msra.gmra.mxu1 %v387_v14 }
 0x283   :  { %v467_v16 = vpop.f32.mrf.mxu1 }
 0x284   :  { %v468_v17 = vadd.f32 %v467_v16, %v393_v15 }
 0x285   :  { %v469_v18 = vpop.f32.mrf.mxu1 }
 0x286   :  { %472 = vst.msk [vmem:[#allocation8] sm:$0x1f] %vm471_vm4, %v468_v17 }
 0x287   :  { %579 = shalt.err (!%p576_p5)
}
 0x288   :  { %482 = dma.vmem_to_hbm [thread:$0]  %s480_s13, 128, %s701_s9, [#allocation4]  }
 0x289   :  { %592 = dma.done.wait [#allocation4], 128  }
 0x28a   :  { %593 = vsyncadd [#allocation4], 4294967168 }
 0x28b   :  { %486 = vsyncpa [#allocation3], 1 }
 0x28c   :  { %487 = vsyncpa [#allocation6], 1 }
 0x28d   :  { %488 = vsyncpa [#allocation4], 1 }

</bundles_post_ra>
